<compile_context>
chip_gen: v7x
topology: tpu7x:2x2x1
jax: 0.10.0
libtpu: 0.0.40
codegen_flags: <defaults>
</compile_context>

<pallas_src>
import jax
import jax.numpy as jnp
from jax.experimental import pallas as pl
from jax.experimental.pallas import tpu as pltpu


def _cdiv(a, b):
    return -(-a // b)


def _round_up(x, m):
    return ((x + m - 1) // m) * m


def _receiver_kernel(msg_ref, dist_ref,
                     w1_ref, b1_ref, w2_ref, b2_ref, w3_ref, b3_ref,
                     out_ref, cat_ref):
    """One batch tile. cat_ref is VMEM scratch of shape (TB, 2H)."""
    cd = w1_ref.dtype                     # MXU compute dtype (f32 or bf16)
    H = w1_ref.shape[1]

    # fc1 + tanh  (f32 accumulation / bias / tanh on every chip generation)
    h1 = jnp.tanh(
        jnp.dot(dist_ref[...].astype(cd), w1_ref[...],
                preferred_element_type=jnp.float32)
        + b1_ref[...]
    )                                     # (TB, H) f32

    # Build [h1 || message] once in VMEM so fc2 is a single K=2H MXU dot
    # (one issue/drain instead of two K=H dots).
    cat_ref[:, :H] = h1.astype(cd)
    cat_ref[:, H:] = msg_ref[...].astype(cd)

    # fc2 + tanh
    h2 = jnp.tanh(
        jnp.dot(cat_ref[...], w2_ref[...], preferred_element_type=jnp.float32)
        + b2_ref[...]
    )                                     # (TB, H) f32

    # fc3  (N=2 lane-masked store; kept as-is per review)
    out_ref[...] = (
        jnp.dot(h2.astype(cd), w3_ref[...], preferred_element_type=jnp.float32)
        + b3_ref[...]
    ).astype(out_ref.dtype)               # (TB, 2)


def init_params(key, n_features, hidden):
    """Deterministic synthetic params; weights stored as (in, out)."""
    ks = jax.random.split(key, 6)
    w1 = jax.random.normal(ks[0], (n_features, hidden), jnp.float32) * 0.1
    b1 = jax.random.normal(ks[1], (1, hidden), jnp.float32) * 0.1
    w2 = jax.random.normal(ks[2], (2 * hidden, hidden), jnp.float32) * 0.1
    b2 = jax.random.normal(ks[3], (1, hidden), jnp.float32) * 0.1
    w3 = jax.random.normal(ks[4], (hidden, 2), jnp.float32) * 0.1
    b3 = jax.random.normal(ks[5], (1, 2), jnp.float32) * 0.1
    return (w1, b1, w2, b2, w3, b3)


def prepare_params(params, compute_dtype=jnp.float32):
    """Once-per-model prep: cast MXU-facing weights to the compute dtype.
    Biases stay f32 (added to the f32 accumulators)."""
    w1, b1, w2, b2, w3, b3 = params
    cd = compute_dtype
    return (w1.astype(cd), b1.astype(jnp.float32),
            w2.astype(cd), b2.astype(jnp.float32),
            w3.astype(cd), b3.astype(jnp.float32))


_SUBLANE = 16                       # covers bf16 sublane packing; fine for f32
_VMEM_TILE_BUDGET = 24 * 1024 * 1024


def _choose_batch_tile(B, block_b, per_row_bytes):
    """Pick a batch tile: big (amortize step overhead), VMEM-capped, and giving
    a >=2-step grid whenever possible (v7x megacore). No wrapper padding is
    needed: the ragged last tile is masked by Pallas."""
    cap = max(_SUBLANE,
              (_VMEM_TILE_BUDGET // max(per_row_bytes, 1)) // _SUBLANE * _SUBLANE)
    bb = max(_SUBLANE, min(block_b, cap) // _SUBLANE * _SUBLANE)
    if B > bb:
        return bb
    if B <= _SUBLANE:
        return B                    # single tile; block dim == full array dim
    half = _round_up(_cdiv(B, 2), _SUBLANE)
    return half if half < B else B


def receiver_forward(message, distractor, prepared, *, block_b=4096):
    """message: (B, H); distractor: (B, d1, d2); prepared = prepare_params(...).

    Streamed inputs are used in their incoming dtype (no wrapper-side cast/pad
    copies); MXU operands are cast to the weight dtype inside the kernel. For
    real HBM-bandwidth savings with bf16, the upstream producer should emit
    bf16 message/distractor directly — this kernel accepts those too.
    """
    w1, b1, w2, b2, w3, b3 = prepared
    B = message.shape[0]
    F, H = w1.shape
    assert message.shape[1] == H
    cd = w1.dtype

    dist_flat = distractor.reshape(B, -1)            # glue: flatten(1, 2)
    assert dist_flat.shape[1] == F

    in_isz = max(jnp.dtype(message.dtype).itemsize,
                 jnp.dtype(dist_flat.dtype).itemsize)
    cd_isz = jnp.dtype(cd).itemsize

    # Per batch-row VMEM footprint: double-buffered in/out streams + scratch.
    per_row = 2 * (F + H) * in_isz + 2 * H * cd_isz + 2 * 2 * 4
    TB = _choose_batch_tile(B, block_b, per_row)
    grid = (_cdiv(B, TB),)                           # ragged tail is masked

    weight_bytes = (F * H + 2 * H * H + H * 2) * cd_isz + (2 * H + 2) * 4
    vmem_bytes = TB * per_row + 2 * weight_bytes
    vmem_limit = int(min(max(2 * vmem_bytes + (4 << 20), 32 << 20), 56 << 20))

    const = lambda i: (0, 0)

    flops = 2 * B * (F * H + 2 * H * H + H * 2)
    transcendentals = 2 * B * H
    bytes_accessed = B * (F + H) * in_isz + B * 2 * 4 + weight_bytes

    out = pl.pallas_call(
        _receiver_kernel,
        out_shape=jax.ShapeDtypeStruct((B, 2), jnp.float32),
        grid=grid,
        in_specs=[
            pl.BlockSpec((TB, H), lambda i: (i, 0)),   # message tile (streamed)
            pl.BlockSpec((TB, F), lambda i: (i, 0)),   # distractor tile (streamed)
            # Weights/biases: constant index_maps -> DMA'd once, VMEM-resident.
            # (Single-buffering via pl.Buffered(1) skipped; footprint is tiny.)
            pl.BlockSpec((F, H), const),               # w1
            pl.BlockSpec((1, H), const),               # b1
            pl.BlockSpec((2 * H, H), const),           # w2 (whole; concat folded in-kernel)
            pl.BlockSpec((1, H), const),               # b2
            pl.BlockSpec((H, 2), const),               # w3
            pl.BlockSpec((1, 2), const),               # b3
        ],
        out_specs=pl.BlockSpec((TB, 2), lambda i: (i, 0)),
        scratch_shapes=[pltpu.VMEM((TB, 2 * H), cd)],  # [h1 || message] buffer
        compiler_params=pltpu.CompilerParams(
            dimension_semantics=("parallel",),         # megacore sharding (v7x)
            vmem_limit_bytes=vmem_limit,
        ),
        cost_estimate=pl.CostEstimate(
            flops=flops,
            transcendentals=transcendentals,
            bytes_accessed=bytes_accessed,
        ),
    )(message, dist_flat, w1, b1, w2, b2, w3, b3)

    return out


def receiver_reference(message, distractor, params):
    """Pure-JAX reference matching the PyTorch forward."""
    w1, b1, w2, b2, w3, b3 = params
    B = message.shape[0]
    d = jnp.tanh(distractor.reshape(B, -1) @ w1 + b1)
    combined = jnp.concatenate([d, message.astype(jnp.float32)], axis=-1)
    h = jnp.tanh(combined @ w2 + b2)
    return h @ w3 + b3


if __name__ == "__main__":
    # Small shapes per the module: batch=8, distractor (8,4,8) -> n_features=32,
    # hidden=32.
    # TODO(synk): H=32 / n_features=32 fill only 32/128 lanes per vreg; pad H/F
    # to 128 at the model level (with the upstream producer emitting the padded
    # layout) if dims are negotiable — not done here to keep the module's
    # semantics.
    B, d1, d2, hidden = 8, 4, 8, 32
    n_features = d1 * d2

    key = jax.random.PRNGKey(0)
    k_msg, k_dist, k_par = jax.random.split(key, 3)

    message = jax.random.normal(k_msg, (B, hidden), jnp.float32)
    distractor = jax.random.normal(k_dist, (B, d1, d2), jnp.float32)
    params = init_params(k_par, n_features, hidden)
    ref = receiver_reference(message, distractor, params)

    # 1) f32 compute path, single tile: exact check.
    prepared_f32 = prepare_params(params, jnp.float32)
    out = receiver_forward(message, distractor, prepared_f32)
    jax.block_until_ready(out)
    assert out.shape == (B, 2)
    assert jnp.allclose(out, ref, atol=1e-5, rtol=1e-5)

    # 2) f32 path with a bigger, non-tile-multiple batch: exercises the >=2-step
    #    "parallel" grid (two v7x TensorCores) and the masked ragged last tile
    #    (no wrapper-side padding copies).
    B2 = 300
    k_msg2, k_dist2 = jax.random.split(jax.random.PRNGKey(1))
    message2 = jax.random.normal(k_msg2, (B2, hidden), jnp.float32)
    distractor2 = jax.random.normal(k_dist2, (B2, d1, d2), jnp.float32)
    ref2 = receiver_reference(message2, distractor2, params)
    out2 = receiver_forward(message2, distractor2, prepared_f32)
    jax.block_until_ready(out2)
    assert out2.shape == (B2, 2)
    assert jnp.allclose(out2, ref2, atol=1e-4, rtol=1e-4)

    # 3) bf16 weight/compute path (streamed inputs stay in their HBM dtype; the
    #    cast happens in-kernel, so no extra pre-kernel HBM pass).
    prepared_bf16 = prepare_params(params, jnp.bfloat16)
    out_bf16 = receiver_forward(message, distractor, prepared_bf16)
    jax.block_until_ready(out_bf16)
    assert out_bf16.shape == (B, 2)
    assert jnp.allclose(out_bf16, ref, atol=5e-2, rtol=5e-2)

    print("KERNEL_OK")
</pallas_src>

<mosaic_0001>
module attributes {stable_mosaic.version = 11 : i64} {
  func.func @_receiver_kernel(%arg0: i32, %arg1: memref<8x32xf32, #tpu.memory_space<vmem>>, %arg2: memref<8x32xf32, #tpu.memory_space<vmem>>, %arg3: memref<32x32xf32, #tpu.memory_space<vmem>>, %arg4: memref<1x32xf32, #tpu.memory_space<vmem>>, %arg5: memref<64x32xf32, #tpu.memory_space<vmem>>, %arg6: memref<1x32xf32, #tpu.memory_space<vmem>>, %arg7: memref<32x2xf32, #tpu.memory_space<vmem>>, %arg8: memref<1x2xf32, #tpu.memory_space<vmem>>, %arg9: memref<8x2xf32, #tpu.memory_space<vmem>>, %arg10: memref<8x64xf32, #tpu.memory_space<vmem>>) attributes {dimension_semantics = [#tpu.dimension_semantics<parallel>], iteration_bounds = array<i64: 1>, scalar_prefetch = 0 : i64, scratch_operands = 1 : i64, tpu.core_type = #tpu.core_type<tc>, window_params = [{transform_indices = @transform_0, window_bounds = array<i64: 8, 32>}, {transform_indices = @transform_1, window_bounds = array<i64: 8, 32>}, {pipeline_mode = #tpu.pipeline_mode<synchronous>, transform_indices = @transform_2, window_bounds = array<i64: 32, 32>}, {pipeline_mode = #tpu.pipeline_mode<synchronous>, transform_indices = @transform_3, window_bounds = array<i64: 1, 32>}, {pipeline_mode = #tpu.pipeline_mode<synchronous>, transform_indices = @transform_4, window_bounds = array<i64: 64, 32>}, {pipeline_mode = #tpu.pipeline_mode<synchronous>, transform_indices = @transform_5, window_bounds = array<i64: 1, 32>}, {pipeline_mode = #tpu.pipeline_mode<synchronous>, transform_indices = @transform_6, window_bounds = array<i64: 32, 2>}, {pipeline_mode = #tpu.pipeline_mode<synchronous>, transform_indices = @transform_7, window_bounds = array<i64: 1, 2>}, {transform_indices = @transform_8, window_bounds = array<i64: 8, 2>}]} {
    %c0 = arith.constant 0 : index
    %c0_0 = arith.constant 0 : index
    %0 = vector.load %arg2[%c0, %c0_0] : memref<8x32xf32, #tpu.memory_space<vmem>>, vector<8x32xf32>
    %c0_1 = arith.constant 0 : index
    %c0_2 = arith.constant 0 : index
    %1 = vector.load %arg3[%c0_1, %c0_2] : memref<32x32xf32, #tpu.memory_space<vmem>>, vector<32x32xf32>
    %cst = arith.constant dense<0.000000e+00> : vector<8x32xf32>
    %2 = tpu.matmul %0, %1, %cst {dimension_numbers = #tpu.dot_dimension_numbers<[1], [0], [0], [1], [0, 0, 1, 1], [], []>} : vector<8x32xf32>, vector<32x32xf32>, vector<8x32xf32> -> vector<8x32xf32>
    %c0_3 = arith.constant 0 : index
    %c0_4 = arith.constant 0 : index
    %3 = vector.load %arg4[%c0_3, %c0_4] : memref<1x32xf32, #tpu.memory_space<vmem>>, vector<1x32xf32>
    %4 = vector.broadcast %3 : vector<1x32xf32> to vector<8x32xf32>
    %5 = arith.addf %2, %4 : vector<8x32xf32>
    %6 = math.tanh %5 : vector<8x32xf32>
    %c0_5 = arith.constant 0 : index
    %c0_6 = arith.constant 0 : index
    %7 = vector.load %arg10[%c0_5, %c0_6] : memref<8x64xf32, #tpu.memory_space<vmem>>, vector<8x32xf32>
    tpu.vector_store %arg10[%c0_5, %c0_6], %6 {strides = array<i32>} : memref<8x64xf32, #tpu.memory_space<vmem>>, vector<8x32xf32>,
    %c0_7 = arith.constant 0 : index
    %c0_8 = arith.constant 0 : index
    %8 = vector.load %arg1[%c0_7, %c0_8] : memref<8x32xf32, #tpu.memory_space<vmem>>, vector<8x32xf32>
    %c0_9 = arith.constant 0 : index
    %c32 = arith.constant 32 : index
    %9 = vector.load %arg10[%c0_9, %c32] : memref<8x64xf32, #tpu.memory_space<vmem>>, vector<8x32xf32>
    tpu.vector_store %arg10[%c0_9, %c32], %8 {strides = array<i32>} : memref<8x64xf32, #tpu.memory_space<vmem>>, vector<8x32xf32>,
    %c0_10 = arith.constant 0 : index
    %c0_11 = arith.constant 0 : index
    %10 = vector.load %arg10[%c0_10, %c0_11] : memref<8x64xf32, #tpu.memory_space<vmem>>, vector<8x64xf32>
    %c0_12 = arith.constant 0 : index
    %c0_13 = arith.constant 0 : index
    %11 = vector.load %arg5[%c0_12, %c0_13] : memref<64x32xf32, #tpu.memory_space<vmem>>, vector<64x32xf32>
    %cst_14 = arith.constant dense<0.000000e+00> : vector<8x32xf32>
    %12 = tpu.matmul %10, %11, %cst_14 {dimension_numbers = #tpu.dot_dimension_numbers<[1], [0], [0], [1], [0, 0, 1, 1], [], []>} : vector<8x64xf32>, vector<64x32xf32>, vector<8x32xf32> -> vector<8x32xf32>
    %c0_15 = arith.constant 0 : index
    %c0_16 = arith.constant 0 : index
    %13 = vector.load %arg6[%c0_15, %c0_16] : memref<1x32xf32, #tpu.memory_space<vmem>>, vector<1x32xf32>
    %14 = vector.broadcast %13 : vector<1x32xf32> to vector<8x32xf32>
    %15 = arith.addf %12, %14 : vector<8x32xf32>
    %16 = math.tanh %15 : vector<8x32xf32>
    %c0_17 = arith.constant 0 : index
    %c0_18 = arith.constant 0 : index
    %17 = vector.load %arg7[%c0_17, %c0_18] : memref<32x2xf32, #tpu.memory_space<vmem>>, vector<32x2xf32>
    %cst_19 = arith.constant dense<0.000000e+00> : vector<8x2xf32>
    %18 = tpu.matmul %16, %17, %cst_19 {dimension_numbers = #tpu.dot_dimension_numbers<[1], [0], [0], [1], [0, 0, 1, 1], [], []>} : vector<8x32xf32>, vector<32x2xf32>, vector<8x2xf32> -> vector<8x2xf32>
    %c0_20 = arith.constant 0 : index
    %c0_21 = arith.constant 0 : index
    %19 = vector.load %arg8[%c0_20, %c0_21] : memref<1x2xf32, #tpu.memory_space<vmem>>, vector<1x2xf32>
    %20 = vector.broadcast %19 : vector<1x2xf32> to vector<8x2xf32>
    %21 = arith.addf %18, %20 : vector<8x2xf32>
    %c0_22 = arith.constant 0 : index
    %c0_23 = arith.constant 0 : index
    %22 = vector.load %arg9[%c0_22, %c0_23] : memref<8x2xf32, #tpu.memory_space<vmem>>, vector<8x2xf32>
    tpu.vector_store %arg9[%c0_22, %c0_23], %21 {strides = array<i32>} : memref<8x2xf32, #tpu.memory_space<vmem>>, vector<8x2xf32>,
    return
  }
  func.func @transform_0(%arg0: i32) -> (i32, i32) {
    %c0_i32 = arith.constant 0 : i32
    %c0_i32_0 = arith.constant 0 : i32
    return %arg0, %c0_i32 : i32, i32
  }
  func.func @transform_1(%arg0: i32) -> (i32, i32) {
    %c0_i32 = arith.constant 0 : i32
    %c0_i32_0 = arith.constant 0 : i32
    return %arg0, %c0_i32 : i32, i32
  }
  func.func @transform_2(%arg0: i32) -> (i32, i32) {
    %c0_i32 = arith.constant 0 : i32
    %c0_i32_0 = arith.constant 0 : i32
    %c0_i32_1 = arith.constant 0 : i32
    return %c0_i32, %c0_i32_0 : i32, i32
  }
  func.func @transform_3(%arg0: i32) -> (i32, i32) {
    %c0_i32 = arith.constant 0 : i32
    %c0_i32_0 = arith.constant 0 : i32
    %c0_i32_1 = arith.constant 0 : i32
    return %c0_i32, %c0_i32_0 : i32, i32
  }
  func.func @transform_4(%arg0: i32) -> (i32, i32) {
    %c0_i32 = arith.constant 0 : i32
    %c0_i32_0 = arith.constant 0 : i32
    %c0_i32_1 = arith.constant 0 : i32
    return %c0_i32, %c0_i32_0 : i32, i32
  }
  func.func @transform_5(%arg0: i32) -> (i32, i32) {
    %c0_i32 = arith.constant 0 : i32
    %c0_i32_0 = arith.constant 0 : i32
    %c0_i32_1 = arith.constant 0 : i32
    return %c0_i32, %c0_i32_0 : i32, i32
  }
  func.func @transform_6(%arg0: i32) -> (i32, i32) {
    %c0_i32 = arith.constant 0 : i32
    %c0_i32_0 = arith.constant 0 : i32
    %c0_i32_1 = arith.constant 0 : i32
    return %c0_i32, %c0_i32_0 : i32, i32
  }
  func.func @transform_7(%arg0: i32) -> (i32, i32) {
    %c0_i32 = arith.constant 0 : i32
    %c0_i32_0 = arith.constant 0 : i32
    %c0_i32_1 = arith.constant 0 : i32
    return %c0_i32, %c0_i32_0 : i32, i32
  }
  func.func @transform_8(%arg0: i32) -> (i32, i32) {
    %c0_i32 = arith.constant 0 : i32
    %c0_i32_0 = arith.constant 0 : i32
    return %arg0, %c0_i32 : i32, i32
  }
}

</mosaic_0001>

<bundles_post_ra>
// kernel: tpu_custom_call.1
= control target key start
LH: loop header
LB: loop body
LE: loop exit
PB: predicated region body
PF: predicated region fallthrough
CT: control target
= control target key end

     0   :  { %v403_v0 = vmov 0.0|0.0   ;;  %vm404_vm0 = vmmov 0   ;;  %v405_v4 = vmov 0.0   ;;  %s406_s15 = smov 32   ;;  %vm41_vm1 = vcmask 261120   ;;  %s532_s2 = inlined_call_operand.vmem [shape: f32[32,32], index: 2, kind: input, shape index: {}]   ;;  %s533_s0 = inlined_call_operand.vmem [shape: f32[8,32], index: 0, kind: input, shape index: {}]   ;;  %s534_s1 = inlined_call_operand.vmem [shape: f32[8,32], index: 1, kind: input, shape index: {}]   ;;  %s535_s4 = inlined_call_operand.vmem [shape: f32[64,32], index: 4, kind: input, shape index: {}]   ;;  %s536_s3 = inlined_call_operand.vmem [shape: f32[1,32], index: 3, kind: input, shape index: {}]   ;;  %s537_s6 = inlined_call_operand.vmem [shape: f32[32,2], index: 6, kind: input, shape index: {}]   ;;  %s538_s5 = inlined_call_operand.vmem [shape: f32[1,32], index: 5, kind: input, shape index: {}]   ;;  %s539_s7 = inlined_call_operand.vmem [shape: f32[1,2], index: 7, kind: input, shape index: {}]   ;;  %s540_s8 = inlined_call_operand.vmem [shape: f32[8,2], index: 8, kind: output, shape index: {}]  }
   0x1   :  { %371 = vmatprep.subr.bf16.mxu0 %v403_v0  ;;  %v30_v1 = vld [vmem:[%s532_s2] sm:$0xff]  ;;  %v31_v2 = vld [vmem:[%s532_s2 + $0x8] sm:$0xff]  ;;  %v32_v3 = vld [vmem:[%s532_s2 + $0x10] sm:$0xff]  ;;  %338 = vmatprep.mubr.msk.f32.mxu0 %vm404_vm0, %v405_v4  ;;  %vm122_vm2 = vcmask 523520   ;;  %vm140_vm3 = vcmask 523264   ;;  %vm299_vm4 = vcmask 15360  }
   0x2   :  { %v372_v5 = vpack.c.bf16 %v31_v2, %v30_v1  ;;  %v33_v6 = vld [vmem:[%s532_s2 + $0x18] sm:$0xff]  ;;  %v117_v7 = vld [vmem:[%s533_s0] sm:$0xff]  ;;  %377 = vmatprep.subr.bf16.mxu1 %v403_v0  ;;  %357 = vmatprep.mubr.msk.f32.mxu1 %vm404_vm0, %v405_v4  ;;  %v126_v11 = vld [vmem:[%s535_s4 + $0x8] sm:$0xff] }
   0x3   :  { %119 = vrot.lane.b32.xlu0 %v117_v7, %s406_s15  ;;  %v375_v8 = vpack.c.bf16 %v33_v6, %v32_v3  ;;  %v29_v9 = vld [vmem:[%s534_s1] sm:$0xff]  ;;  %v127_v13 = vld [vmem:[%s535_s4 + $0x10] sm:$0xff]  ;;  %v128_v14 = vld [vmem:[%s535_s4 + $0x18] sm:$0xff] }
   0x4   :  { %373 = vmatpush3.bf16.msra.mxu0 %v372_v5  ;;  %v125_v10 = vld [vmem:[%s535_s4] sm:$0xff]  ;;  %v381_v15 = vpack.c.bf16 %v128_v14, %v127_v13  ;;  %v130_v17 = vld [vmem:[%s535_s4 + $0x28] sm:$0xff]  ;;  %v131_v19 = vld [vmem:[%s535_s4 + $0x30] sm:$0xff] }
   0x5   :  { %374 = vmatprep.subr.bf16.mxu0 %v403_v0  ;;  %v378_v12 = vpack.c.bf16 %v126_v11, %v125_v10  ;;  %v129_v16 = vld [vmem:[%s535_s4 + $0x20] sm:$0xff]  ;;  %v132_v20 = vld [vmem:[%s535_s4 + $0x38] sm:$0xff]  ;;  %v216_v30 = vld [vmem:[%s537_s6 + $0x8] sm:$0xff] }
   0x6   :  { %v384_v18 = vpack.c.bf16 %v130_v17, %v129_v16  ;;  %v387_v21 = vpack.c.bf16 %v132_v20, %v131_v19  ;;  %v305_v22 = vld [vmem:[%s536_s3] ss:$0 sm:$0xff]  ;;  %v217_v31 = vld [vmem:[%s537_s6 + $0x10] sm:$0xff]  ;;  %v218_v33 = vld [vmem:[%s537_s6 + $0x18] sm:$0xff] }
   0x7   :  { %379 = vmatpush3.bf16.msra.mxu1 %v378_v12  ;;  %v215_v29 = vld [vmem:[%s537_s6] sm:$0xff]  ;;  %v393_v34 = vpack.c.bf16 %v218_v33, %v217_v31 }
   0x8   :  { %376 = vmatpush3.bf16.msra.mxu0 %v375_v8  ;;  %380 = vmatprep.subr.bf16.mxu1 %v403_v0  ;;  %v390_v32 = vpack.c.bf16 %v216_v30, %v215_v29  ;;  %v307_v35 = vld [vmem:[%s538_s5] ss:$0 sm:$0xff] }
   0x9   :  { %389 = vmatprep.subr.bf16.mxu0 %v403_v0  ;;  %v309_v40 = vld [vmem:[%s539_s7] ss:$0 sm:$0xff] }
   0xb   :  { %339 = vmatmul.mubr.msk.f32.vlgmr.msra.gmra.mrb[0].mxu0 %vm41_vm1, %v29_v9  ;;  %382 = vmatpush3.bf16.msra.mxu1 %v381_v15 }
   0xc   :  { %368 = vmatprep.mubr.msk.f32.mxu0 %vm404_vm0, %v405_v4  ;;  %383 = vmatprep.subr.bf16.mxu1 %v403_v0 }
   0xd   :  { %391 = vmatpush3.bf16.msra.mxu0 %v390_v32 }
   0xe   :  { %392 = vmatprep.subr.bf16.mxu0 %v403_v0 }
   0xf   :  { %385 = vmatpush3.bf16.msra.mxu1 %v384_v18 }
  0x10   :  { %386 = vmatprep.subr.bf16.mxu1 %v403_v0 }
  0x11   :  { %394 = vmatpush3.bf16.msra.mxu0 %v393_v34 }
  0x13   :  { %388 = vmatpush3.bf16.msra.mxu1 %v387_v21 }
  0x75   :  { %v120_v26 = vpop.permute.xlu0 %119 }
  0xde   :  { %v111_v23 = vpop.f32.mrb[0].mxu0 }
  0xdf   :  { %v112_v24 = vadd.f32 %v305_v22, %v111_v23  ;;  %v340_v25 = vpop.f32.mrb[1].mxu0 }
  0xe1   :  { %399 = vtanh.f32 %v112_v24 }
  0xeb   :  { %v400_v27 = vpop.eup %399 }
  0xec   :  { %116 = vst.msk [vmem:[#allocation2] sm:$0xff] %vm41_vm1, %v400_v27 }
  0xed   :  { %123 = vst.msk [vmem:[#allocation2] sm:$0xff] %vm122_vm2, %v120_v26 }
  0xf4   :  { %v124_v28 = vld [vmem:[#allocation2] sm:$0xff] }
  0xf5   :  { %358 = vmatmul.mubr.msk.f32.vlgmr.msra.gmra.mrb[0].mxu1 %vm140_vm3, %v124_v28 }
 0x1c8   :  { %v210_v36 = vpop.f32.mrb[0].mxu1 }
 0x1c9   :  { %v211_v37 = vadd.f32 %v307_v35, %v210_v36  ;;  %v359_v38 = vpop.f32.mrb[1].mxu1 }
 0x1cb   :  { %401 = vtanh.f32 %v211_v37 }
 0x1d5   :  { %v402_v39 = vpop.eup %401 }
 0x1d6   :  { %369 = vmatmul.mubr.msk.f32.vlgmr.msra.gmra.mrb[2].mxu0 %vm41_vm1, %v402_v39 }
 0x2a9   :  { %v295_v41 = vpop.f32.mrb[2].mxu0 }
 0x2aa   :  { %v296_v42 = vadd.f32 %v309_v40, %v295_v41  ;;  %v370_v43 = vpop.f32.mrb[3].mxu0 }
 0x2ac   :  { %300 = vst.msk [vmem:[%s540_s8] sm:$0xff] %vm299_vm4, %v296_v42 }

</bundles_post_ra>
